<compile_context>
chip_gen: v7x
topology: tpu7x:2x2x1
jax: 0.10.0
libtpu: 0.0.40
codegen_flags: <defaults>
</compile_context>

<pallas_src>
import jax
import jax.numpy as jnp
from jax.experimental import pallas as pl
from jax.experimental.pallas import tpu as pltpu


def policy_kernel(s_ref, x_ref, p_ref, o_ref):
    # s_ref : SMEM (3,)      = [Q0, Q1, b2[0]]
    # x_ref : VMEM (B, D)    states
    # p_ref : VMEM (D+3, H)  packed params: rows [0:D]=W1[:D], D=W1[D] (gm row),
    #                        D+1=b1, D+2=w2[:,0]^T
    # o_ref : VMEM (B, 1)    policy output column
    x = x_ref[...]                                   # (B, D)
    B, D = x.shape

    # ---- macroEngine.GMoment(K, Q), K = x[:, 2:3] ---------------------------
    # NOTE: NaN if the aggregate moment is <= 0 (same behaviour as reference).
    m = jnp.sum(x[:, 2:3]) * jnp.float32(1.0 / B)    # mean(K), scalar
    gm = jnp.exp(s_ref[0] + s_ref[1] * jnp.log(m))   # scalar == expanded column
    b2 = s_ref[2]

    # ---- packed parameter slab (single VMEM load) ---------------------------
    p = p_ref[...]                                   # (D+3, H)
    w1b = p[D:D + 1, :]                              # (1, H) row applied to gm
    b1 = p[D + 1:D + 2, :]                           # (1, H)
    w2t = p[D + 2:D + 3, :]                          # (1, H) == w2[:, 0]^T

    # ---- layer 1: cat([x, gm]) @ W1 + b1, done on the VPU --------------------
    # (B,D)@(D,H) with D=4 is a rounding error for the MXU; D broadcast-FMA
    # steps avoid the systolic push/drain latency entirely.
    h = gm * w1b + b1                                # (1, H)
    for d in range(D):                               # static unroll (D tiny)
        h = h + x[:, d:d + 1] * p[d:d + 1, :]        # (B, H)
    h = jnp.maximum(h, 0.0)                          # ReLU

    # ---- layer 2: (H -> 1), VPU multiply + XLU lane reduction ---------------
    o = jnp.sum(h * w2t, axis=-1, keepdims=True) + b2   # (B, 1)
    o_ref[...] = o


def policy_model_forward(x, Q, w1, b1, w2, b2):
    """x: (B, D) f32; Q: (2,) f32; w1: (D+1, H); b1: (H,); w2: (H, O); b2: (O,)."""
    x = x.astype(jnp.float32)
    B, D = x.shape
    H = w1.shape[1]

    # Pack everything the kernel needs into one VMEM slab + one SMEM scalar vec.
    # Only column 0 of the policy head is used (module returns pol(Input)[:, 0]).
    slab = jnp.concatenate(
        [w1.astype(jnp.float32),                  # rows 0..D   (x rows + gm row)
         b1.reshape(1, H).astype(jnp.float32),    # row  D+1
         w2[:, :1].T.astype(jnp.float32)],        # row  D+2    (w2[:,0]^T)
        axis=0,
    )                                             # (D+3, H)
    scal = jnp.concatenate(
        [Q.astype(jnp.float32).reshape(2), b2.astype(jnp.float32).reshape(-1)[:1]]
    )                                             # (3,) = [Q0, Q1, b2[0]]

    vmem = pl.BlockSpec(memory_space=pltpu.MemorySpace.VMEM)
    smem = pl.BlockSpec(memory_space=pltpu.MemorySpace.SMEM)

    out = pl.pallas_call(
        policy_kernel,
        out_shape=jax.ShapeDtypeStruct((B, 1), jnp.float32),
        in_specs=[smem, vmem, vmem],
        out_specs=vmem,
    )(scal, x, slab)

    return out[:, 0]                              # (B,)


def reference_forward(x, Q, w1, b1, w2, b2):
    """Plain-JAX reference mirroring the PyTorch semantics."""
    K = x[:, 2:3]
    m = jnp.mean(K)
    gm = jnp.exp(Q[0] + Q[1] * jnp.log(m))
    gm_col = jnp.broadcast_to(gm, (x.shape[0], 1)).astype(x.dtype)
    inp = jnp.concatenate([x, gm_col], axis=1)
    h = jnp.maximum(inp @ w1 + b1, 0.0)
    o = h @ w2 + b2
    return o[:, 0]


if __name__ == "__main__":
    B, D, H, O = 8, 4, 32, 1

    key = jax.random.PRNGKey(0)
    kx, kq, kw1, kb1, kw2, kb2 = jax.random.split(key, 6)

    # x must have column index 2 (K); keep it positive for the log-linear rule.
    x = jax.random.uniform(kx, (B, D), jnp.float32, minval=0.5, maxval=1.5)
    Q = jax.random.normal(kq, (2,), jnp.float32) * 0.1

    w1 = jax.random.normal(kw1, (D + 1, H), jnp.float32) * 0.2
    b1 = jax.random.normal(kb1, (H,), jnp.float32) * 0.1
    w2 = jax.random.normal(kw2, (H, O), jnp.float32) * 0.2
    b2 = jax.random.normal(kb2, (O,), jnp.float32) * 0.1

    out = policy_model_forward(x, Q, w1, b1, w2, b2)
    out = jax.block_until_ready(out)

    ref = reference_forward(x, Q, w1, b1, w2, b2)
    assert out.shape == (B,)
    assert jnp.allclose(out, ref, atol=1e-5, rtol=1e-5), (out, ref)

    print("KERNEL_OK")
</pallas_src>

<mosaic_0001>
module attributes {stable_mosaic.version = 11 : i64} {
  func.func @policy_kernel(%arg0: memref<3xf32, #tpu.memory_space<smem>>, %arg1: memref<8x4xf32, #tpu.memory_space<vmem>>, %arg2: memref<7x32xf32, #tpu.memory_space<vmem>>, %arg3: memref<8x1xf32, #tpu.memory_space<vmem>>) attributes {dimension_semantics = [], scalar_prefetch = 0 : i64, scratch_operands = 0 : i64, tpu.core_type = #tpu.core_type<tc>} {
    %c0 = arith.constant 0 : index
    %c0_0 = arith.constant 0 : index
    %0 = vector.load %arg1[%c0, %c0_0] : memref<8x4xf32, #tpu.memory_space<vmem>>, vector<8x4xf32>
    %1 = vector.extract_strided_slice %0 {offsets = [0, 2], sizes = [8, 1], strides = [1, 1]} : vector<8x4xf32> to vector<8x1xf32>
    %2 = vector.shape_cast %1 : vector<8x1xf32> to vector<1x8x1xf32>
    %cst = arith.constant dense<0.000000e+00> : vector<1xf32>
    %3 = vector.multi_reduction <add>, %2, %cst [1, 2] : vector<1x8x1xf32> to vector<1xf32>
    %4 = vector.shape_cast %3 : vector<1xf32> to vector<1x1x1xf32>
    %5 = vector.extract %4[0, 0, 0] : f32 from vector<1x1x1xf32>
    %cst_1 = arith.constant 1.250000e-01 : f32
    %6 = arith.mulf %5, %cst_1 : f32
    %c0_2 = arith.constant 0 : index
    %7 = memref.load %arg0[%c0_2] : memref<3xf32, #tpu.memory_space<smem>>
    %c1 = arith.constant 1 : index
    %8 = memref.load %arg0[%c1] : memref<3xf32, #tpu.memory_space<smem>>
    %9 = math.log %6 : f32
    %10 = arith.mulf %8, %9 : f32
    %11 = arith.addf %7, %10 : f32
    %12 = math.exp %11 : f32
    %c2 = arith.constant 2 : index
    %13 = memref.load %arg0[%c2] : memref<3xf32, #tpu.memory_space<smem>>
    %c0_3 = arith.constant 0 : index
    %c0_4 = arith.constant 0 : index
    %14 = vector.load %arg2[%c0_3, %c0_4] : memref<7x32xf32, #tpu.memory_space<vmem>>, vector<7x32xf32>
    %15 = vector.extract_strided_slice %14 {offsets = [4, 0], sizes = [1, 32], strides = [1, 1]} : vector<7x32xf32> to vector<1x32xf32>
    %16 = vector.extract_strided_slice %14 {offsets = [5, 0], sizes = [1, 32], strides = [1, 1]} : vector<7x32xf32> to vector<1x32xf32>
    %17 = vector.extract_strided_slice %14 {offsets = [6, 0], sizes = [1, 32], strides = [1, 1]} : vector<7x32xf32> to vector<1x32xf32>
    %18 = vector.broadcast %12 : f32 to vector<1x32xf32>
    %19 = arith.mulf %18, %15 : vector<1x32xf32>
    %20 = arith.addf %19, %16 : vector<1x32xf32>
    %21 = vector.extract_strided_slice %0 {offsets = [0, 0], sizes = [8, 1], strides = [1, 1]} : vector<8x4xf32> to vector<8x1xf32>
    %22 = vector.extract_strided_slice %14 {offsets = [0, 0], sizes = [1, 32], strides = [1, 1]} : vector<7x32xf32> to vector<1x32xf32>
    %23 = vector.broadcast %21 : vector<8x1xf32> to vector<8x32xf32>
    %24 = vector.broadcast %22 : vector<1x32xf32> to vector<8x32xf32>
    %25 = arith.mulf %23, %24 : vector<8x32xf32>
    %26 = vector.broadcast %20 : vector<1x32xf32> to vector<8x32xf32>
    %27 = arith.addf %26, %25 : vector<8x32xf32>
    %28 = vector.extract_strided_slice %0 {offsets = [0, 1], sizes = [8, 1], strides = [1, 1]} : vector<8x4xf32> to vector<8x1xf32>
    %29 = vector.extract_strided_slice %14 {offsets = [1, 0], sizes = [1, 32], strides = [1, 1]} : vector<7x32xf32> to vector<1x32xf32>
    %30 = vector.broadcast %28 : vector<8x1xf32> to vector<8x32xf32>
    %31 = vector.broadcast %29 : vector<1x32xf32> to vector<8x32xf32>
    %32 = arith.mulf %30, %31 : vector<8x32xf32>
    %33 = arith.addf %27, %32 : vector<8x32xf32>
    %34 = vector.extract_strided_slice %0 {offsets = [0, 2], sizes = [8, 1], strides = [1, 1]} : vector<8x4xf32> to vector<8x1xf32>
    %35 = vector.extract_strided_slice %14 {offsets = [2, 0], sizes = [1, 32], strides = [1, 1]} : vector<7x32xf32> to vector<1x32xf32>
    %36 = vector.broadcast %34 : vector<8x1xf32> to vector<8x32xf32>
    %37 = vector.broadcast %35 : vector<1x32xf32> to vector<8x32xf32>
    %38 = arith.mulf %36, %37 : vector<8x32xf32>
    %39 = arith.addf %33, %38 : vector<8x32xf32>
    %40 = vector.extract_strided_slice %0 {offsets = [0, 3], sizes = [8, 1], strides = [1, 1]} : vector<8x4xf32> to vector<8x1xf32>
    %41 = vector.extract_strided_slice %14 {offsets = [3, 0], sizes = [1, 32], strides = [1, 1]} : vector<7x32xf32> to vector<1x32xf32>
    %42 = vector.broadcast %40 : vector<8x1xf32> to vector<8x32xf32>
    %43 = vector.broadcast %41 : vector<1x32xf32> to vector<8x32xf32>
    %44 = arith.mulf %42, %43 : vector<8x32xf32>
    %45 = arith.addf %39, %44 : vector<8x32xf32>
    %cst_5 = arith.constant 0.000000e+00 : f32
    %46 = vector.broadcast %cst_5 : f32 to vector<8x32xf32>
    %47 = arith.maximumf %45, %46 : vector<8x32xf32>
    %48 = vector.broadcast %17 : vector<1x32xf32> to vector<8x32xf32>
    %49 = arith.mulf %47, %48 : vector<8x32xf32>
    %cst_6 = arith.constant dense<0.000000e+00> : vector<8xf32>
    %50 = vector.multi_reduction <add>, %49, %cst_6 [1] : vector<8x32xf32> to vector<8xf32>
    %51 = vector.shape_cast %50 : vector<8xf32> to vector<8x1xf32>
    %52 = vector.broadcast %13 : f32 to vector<8x1xf32>
    %53 = arith.addf %51, %52 : vector<8x1xf32>
    %c0_7 = arith.constant 0 : index
    %c0_8 = arith.constant 0 : index
    %54 = vector.load %arg3[%c0_7, %c0_8] : memref<8x1xf32, #tpu.memory_space<vmem>>, vector<8x1xf32>
    tpu.vector_store %arg3[%c0_7, %c0_8], %53 {strides = array<i32>} : memref<8x1xf32, #tpu.memory_space<vmem>>, vector<8x1xf32>,
    return
  }
}

</mosaic_0001>

<bundles_post_ra>
// kernel: tpu_custom_call.1
= control target key start
LH: loop header
LB: loop body
LE: loop exit
PB: predicated region body
PF: predicated region fallthrough
CT: control target
= control target key end

     0   :  { %8 = vsyncpa [#allocation3], 0  ;;  %s203_s0 = inlined_call_operand.vmem [shape: f32[3], index: 0, kind: input, shape index: {}]   ;;  %s204_s1 = inlined_call_operand.vmem [shape: f32[8,4], index: 1, kind: input, shape index: {}]   ;;  %s205_s2 = inlined_call_operand.vmem [shape: f32[7,32], index: 2, kind: input, shape index: {}]   ;;  %s206_s3 = inlined_call_operand.vmem [shape: f32[8,1], index: 3, kind: output, shape index: {}]  }
   0x1   :  { %s15_s14 = sshll.u32 %s203_s0, 4  ;;  %s16_s14 = int_to_ptr.vmem [resolvable:$true] %s15_s14 }
   0x2   :  { %s149_s15 = scalar_lea.vmem %s16_s14, 16  ;;  %p154_p1 = scmp.lt.s32.totalorder %s16_s14, %s16_s14 }
   0x3   :  { %p150_p0 = scmp.ne.s32.totalorder %s16_s14, %s149_s15  ;;  %p155_p2 = scmp.lt.s32.totalorder %s149_s15, %s149_s15 }
   0x5   :  { %p156_p3 = por %p155_p2, %p154_p1 }
   0x7   :  { %p157_p4 = pnand %p156_p3, %p150_p0 }
   0x9   :  { %160 = shalt.err (!%p157_p4)
}
   0xa   :  { %s163_s16 = smov [#allocation2]  }
   0xb   :  { %18 = dma.vmem_to_smem %s16_s14, 16, %s163_s16, [#allocation3]  }
   0xc   :  { %161 = dma.done.wait [#allocation3], 16  }
   0xd   :  { %162 = vsyncadd [#allocation3], 4294967280 }
   0xe   :  { %26 = sfence }
   0xf   :  { %v27_v0 = vld [vmem:[%s204_s1] sm:$0xff]  ;;  %s164_s19 = smov 126   ;;  %vm32_vm0 = vcmask 7168   ;;  %v165_v3 = vmov 0   ;;  %v166_v4 = vmov 3   ;;  %v167_v5 = vmov 1  }
  0x10   :  { %29 = vrot.lane.b32.xlu0 %v27_v0, %s164_s19  ;;  %140 = vset.pattern.permute.xlu1 %v165_v3  ;;  %v168_v6 = vmov 2   ;;  %s126_s20 = sld [smem:[#allocation2 + $0x1]]  ;;  %s44_s21 = sld [smem:[#allocation2]]  ;;  %v68_v20 = vlaneseq  ;;  %v57_v25 = vld [vmem:[%s205_s2] sm:$0x7f]  ;;  %vm114_vm1 = vcmask 261120  }
  0x11   :  { %65 = vperm.xlu1 %140, %v27_v0   ;;  %144 = vset.pattern.permute.xlu0 %v166_v4  ;;  %v61_v26 = vrot.slane %v57_v25, 1  ;;  %s127_s2 = sld [smem:[#allocation2 + $0x2]] }
  0x12   :  { %v69_v22 = vshrl.u32 %v68_v20, 7 }
  0x14   :  { %v70_v24 = vsub.s32 0, %v69_v22  ;;  %v84_v27 = vsub.s32 1, %v69_v22  ;;  %v75_v32 = vsub.s32 4, %v69_v22  ;;  %v94_v33 = vsub.s32 2, %v69_v22 }
  0x15   :  { %141 = vset.pattern.permute.xlu1 %v167_v5  ;;  %v104_v34 = vsub.s32 3, %v69_v22  ;;  %v111_v47 = vsub.s32 6, %v69_v22 }
  0x16   :  { %79 = vperm.xlu1 %141, %v27_v0   ;;  %v71_v28 = vrot.slane %v57_v25, %v70_v24  ;;  %v85_v36 = vrot.slane %v57_v25, %v84_v27  ;;  %v95_v39 = vrot.slane %v57_v25, %v94_v33 }
  0x17   :  { %v105_v40 = vrot.slane %v57_v25, %v104_v34  ;;  %v112_v50 = vrot.slane %v57_v25, %v111_v47  ;;  %v118_v54 = vstv %s127_s2 }
  0x1a   :  { %142 = vset.pattern.permute.xlu1 %v168_v6 }
  0x1b   :  { %89 = vperm.xlu1 %142, %v27_v0  }
  0x1f   :  { %143 = vset.pattern.permute.xlu1 %v166_v4 }
  0x20   :  { %99 = vperm.xlu1 %143, %v27_v0  }
  0x82   :  { %v30_v1 = vpop.permute.xlu0 %29 }
  0x83   :  { %v33_v2 = vsel %vm32_vm0, %v30_v1, 0.0 }
  0x84   :  { %34 = vadd.xlane.f32.xlu0 %v33_v2 }
  0x90   :  { %v66_v21 = vpop.permute.xlu1 %65 }
  0x91   :  { %v72_v37 = vmul.f32 %v71_v28, %v66_v21 }
  0x95   :  { %v80_v23 = vpop.permute.xlu1 %79 }
  0x96   :  { %v86_v43 = vmul.f32 %v85_v36, %v80_v23 }
  0x9a   :  { %v90_v30 = vpop.permute.xlu1 %89 }
  0x9b   :  { %v96_v45 = vmul.f32 %v95_v39, %v90_v30 }
  0x9f   :  { %v100_v41 = vpop.permute.xlu1 %99 }
  0xa0   :  { %v106_v46 = vmul.f32 %v105_v40, %v100_v41 }
 0x111   :  { %v35_v7 = vpop.xlane.xlu0 %34 }
 0x112   :  { %v36_v8 = vrot.slane %v35_v7, 4 }
 0x114   :  { %v37_v9 = vadd.f32 %v36_v8, %v35_v7 }
 0x116   :  { %v38_v10 = vrot.slane %v37_v9, 2 }
 0x118   :  { %v39_v11 = vadd.f32 %v38_v10, %v37_v9 }
 0x11a   :  { %v40_v12 = vrot.slane %v39_v11, 1 }
 0x11c   :  { %v41_v13 = vadd.f32 %v40_v12, %v39_v11 }
 0x11e   :  { %128 = vpush %v41_v13 }
 0x14f   :  { %s129_s0 = spop %128 }
 0x150   :  { %s43_s1 = smul.f32 0.125, %s129_s0 }
 0x152   :  { %v46_v14 = vstv %s43_s1 }
 0x153   :  { %145 = vlog2.f32 %v46_v14 }
 0x15d   :  { %v146_v15 = vpop.eup %145 }
 0x15e   :  { %v48_v16 = vmul.f32 0.6931472, %v146_v15 }
 0x160   :  { %130 = vpush %v48_v16 }
 0x191   :  { %s131_s22 = spop %130 }
 0x192   :  { %s50_s23 = smul.f32 %s131_s22, %s126_s20 }
 0x194   :  { %s51_s24 = sadd.f32 %s50_s23, %s44_s21 }
 0x196   :  { %v52_v17 = vstv %s51_s24 }
 0x197   :  { %v53_v18 = vmul.f32 1.442695, %v52_v17 }
 0x199   :  { %147 = vpow2.f32 %v53_v18 }
 0x1a3   :  { %v148_v19 = vpop.eup %147 }
 0x1a4   :  { %132 = vpush %v148_v19 }
 0x1d5   :  { %s133_s27 = spop %132 }
 0x1d6   :  { %v58_v29 = vstv %s133_s27 }
 0x1d7   :  { %v59_v31 = vmul.f32 %v58_v29, %v57_v25 }
 0x1d9   :  { %v63_v35 = vadd.f32 %v61_v26, %v59_v31 }
 0x1db   :  { %v76_v38 = vrot.slane %v63_v35, %v75_v32 }
 0x1dd   :  { %v77_v42 = vadd.f32 %v76_v38, %v72_v37 }
 0x1df   :  { %v87_v44 = vadd.f32 %v86_v43, %v77_v42 }
 0x1e1   :  { %v97_v48 = vadd.f32 %v96_v45, %v87_v44 }
 0x1e3   :  { %v107_v49 = vadd.f32 %v106_v46, %v97_v48 }
 0x1e5   :  { %v108_v51 = vmax.f32 %v107_v49, 0.0 }
 0x1e7   :  { %v113_v52 = vmul.f32 %v112_v50, %v108_v51 }
 0x1e9   :  { %v115_v53 = vsel %vm114_vm1, %v113_v52, 0.0 }
 0x1ea   :  { %116 = vadd.xlane.f32.xlu1 %v115_v53 }
 0x277   :  { %v117_v55 = vpop.xlane.xlu1 %116 }
 0x278   :  { %v119_v56 = vadd.f32 %v118_v54, %v117_v55 }
 0x27a   :  { %120 = vst.msk [vmem:[%s206_s3] sm:$0xff] %vm32_vm0, %v119_v56 }
 0x27b   :  { %125 = vsyncpa [#allocation3], 1 }

</bundles_post_ra>
